<compile_context>
chip_gen: v7x
topology: tpu7x:2x2x1
jax: 0.10.0
libtpu: 0.0.40
codegen_flags: <defaults>
</compile_context>

<pallas_src>
import functools

import jax
import jax.numpy as jnp
from jax import lax
from jax.experimental import pallas as pl
from jax.experimental.pallas import tpu as pltpu


# ---------------------------------------------------------------------------
# Kernel
# ---------------------------------------------------------------------------
def _stochastic_net_kernel(s_ref, z_ref,
                           w1s_ref, w1b_ref, b1_ref,
                           w2_ref, b2_ref,
                           wh_ref, bh_ref,
                           out_ref, *, out_dim):
    mm_dtype = w1s_ref.dtype  # matmul operand dtype (f32 or bf16)

    s = s_ref[...].astype(mm_dtype)
    z = z_ref[...].astype(mm_dtype)

    # fc1 + ReLU.  concat(state, belief) @ w1  ==  s @ w1[:sd] + z @ w1[sd:]
    # (two K-slices summed in the same f32 accumulator == one K-wide matmul).
    h = (jnp.dot(s, w1s_ref[...], preferred_element_type=jnp.float32)
         + jnp.dot(z, w1b_ref[...], preferred_element_type=jnp.float32)
         + b1_ref[...])
    h = jnp.maximum(h, 0.0)

    # fc2 + ReLU (epilogue stays f32; only MXU operands may be bf16).
    h = jnp.dot(h.astype(mm_dtype), w2_ref[...],
                preferred_element_type=jnp.float32) + b2_ref[...]
    h = jnp.maximum(h, 0.0)

    # Fused heads: one [h_dim, 2*out_dim] matmul -> [TB, 2*out_dim] slab.
    y = jnp.dot(h.astype(mm_dtype), wh_ref[...],
                preferred_element_type=jnp.float32) + bh_ref[...]

    # Left half = mean (identity).  Right half = std = exp(clip(logstd, -2, 2)).
    # Applied via a lane-index mask (built at width 1 on the sublane axis and
    # broadcast) so the output is one unmasked full-tile store -- no lane
    # shuffles, no split stores.  The "wasted" exp on the mean lanes rides the
    # otherwise-idle EUP slot.
    is_std_lane = lax.broadcasted_iota(jnp.int32, (1, y.shape[1]), 1) >= out_dim
    std_val = jnp.exp(jnp.clip(y, -2.0, 2.0))
    out_ref[...] = jnp.where(is_std_lane, std_val, y)


# ---------------------------------------------------------------------------
# Host-side parameter fusion (do once, outside the hot loop)
# ---------------------------------------------------------------------------
def fuse_params(params, state_dim, matmul_dtype=jnp.float32):
    """Split w1 by input (state|belief), concat the two heads, pre-cast weights.

    Biases stay f32 (the epilogue is always f32)."""
    w1 = params["w1"]
    return {
        "w1s": w1[:state_dim].astype(matmul_dtype),
        "w1b": w1[state_dim:].astype(matmul_dtype),
        "b1": params["b1"].astype(jnp.float32),
        "w2": params["w2"].astype(matmul_dtype),
        "b2": params["b2"].astype(jnp.float32),
        "wh": jnp.concatenate([params["wm"], params["ws"]], axis=1).astype(matmul_dtype),
        "bh": jnp.concatenate([params["bm"], params["bs"]], axis=1).astype(jnp.float32),
    }


def _pick_block_b(B):
    """Batch tile: full batch when small; otherwise a large multiple-of-8 tile
    so the grid gives activation double-buffering + megacore sharding."""
    for tb in (512, 256, 128):
        if B % tb == 0 and B > tb:
            return tb
    return B


# ---------------------------------------------------------------------------
# Wrapper
# ---------------------------------------------------------------------------
def stochastic_net_gaussian_forward(state, belief, fused, *, block_b=None):
    """Pallas equivalent of StochasticNet_Gaussian.forward -> (mean, std)."""
    B, state_dim = state.shape
    belief_dim = belief.shape[1]
    h_dim = fused["w2"].shape[0]
    two_out = fused["wh"].shape[1]
    out_dim = two_out // 2

    TB = block_b if block_b is not None else _pick_block_b(B)
    assert B % TB == 0, "batch must be divisible by the batch tile"
    grid = (B // TB,)

    act_spec = lambda d: pl.BlockSpec((TB, d), lambda i: (i, 0))
    # Weights/biases: full array, constant index_map -> resident in VMEM
    # across all grid steps (loaded once).
    wspec = lambda a: pl.BlockSpec(a.shape, lambda i: (0, 0))

    w_bytes = sum(int(fused[k].size) * fused[k].dtype.itemsize for k in fused)
    flops = 2 * B * ((state_dim + belief_dim) * h_dim + h_dim * h_dim
                     + h_dim * two_out)
    bytes_accessed = (state.size + belief.size) * 4 + B * two_out * 4 + w_bytes

    kernel = pl.pallas_call(
        functools.partial(_stochastic_net_kernel, out_dim=out_dim),
        out_shape=jax.ShapeDtypeStruct((B, two_out), jnp.float32),
        grid=grid,
        in_specs=[
            act_spec(state_dim),
            act_spec(belief_dim),
            wspec(fused["w1s"]), wspec(fused["w1b"]), wspec(fused["b1"]),
            wspec(fused["w2"]), wspec(fused["b2"]),
            wspec(fused["wh"]), wspec(fused["bh"]),
        ],
        out_specs=pl.BlockSpec((TB, two_out), lambda i: (i, 0)),
        compiler_params=pltpu.CompilerParams(
            dimension_semantics=("parallel",)),
        cost_estimate=pl.CostEstimate(
            flops=flops,
            transcendentals=B * two_out,
            bytes_accessed=bytes_accessed),
    )
    packed = kernel(
        state, belief,
        fused["w1s"], fused["w1b"], fused["b1"],
        fused["w2"], fused["b2"],
        fused["wh"], fused["bh"],
    )
    return packed[:, :out_dim], packed[:, out_dim:]


# ---------------------------------------------------------------------------
# Params / reference
# ---------------------------------------------------------------------------
def init_params(key, in_dim, h_dim, out_dim):
    """Deterministic synthetic parameters matching nn.Linear shapes
    (stored transposed: [in_features, out_features])."""
    ks = jax.random.split(key, 8)
    scale = 0.1
    return {
        "w1": scale * jax.random.normal(ks[0], (in_dim, h_dim), jnp.float32),
        "b1": scale * jax.random.normal(ks[1], (1, h_dim), jnp.float32),
        "w2": scale * jax.random.normal(ks[2], (h_dim, h_dim), jnp.float32),
        "b2": scale * jax.random.normal(ks[3], (1, h_dim), jnp.float32),
        "wm": scale * jax.random.normal(ks[4], (h_dim, out_dim), jnp.float32),
        "bm": scale * jax.random.normal(ks[5], (1, out_dim), jnp.float32),
        "ws": scale * jax.random.normal(ks[6], (h_dim, out_dim), jnp.float32),
        "bs": scale * jax.random.normal(ks[7], (1, out_dim), jnp.float32),
    }


def _reference_forward(state, belief, params):
    """Plain-JAX reference for correctness checking."""
    x = jnp.concatenate([state, belief], axis=1)
    h = jax.nn.relu(x @ params["w1"] + params["b1"])
    h = jax.nn.relu(h @ params["w2"] + params["b2"])
    mean = h @ params["wm"] + params["bm"]
    logstd = jnp.clip(h @ params["ws"] + params["bs"], -2.0, 2.0)
    return mean, jnp.exp(logstd)


# ---------------------------------------------------------------------------
# Main
# ---------------------------------------------------------------------------
if __name__ == "__main__":
    B = 8
    state_dim = 16
    belief_dim = 16
    in_dim = state_dim + belief_dim
    h_dim = 32
    out_dim = 16

    key = jax.random.PRNGKey(0)
    k_state, k_belief, k_params = jax.random.split(key, 3)

    state = jax.random.normal(k_state, (B, state_dim), jnp.float32)
    belief = jax.random.normal(k_belief, (B, belief_dim), jnp.float32)
    params = init_params(k_params, in_dim, h_dim, out_dim)
    ref_mean, ref_std = _reference_forward(state, belief, params)

    # --- f32 matmul path (exact) -------------------------------------------
    fused_f32 = fuse_params(params, state_dim, matmul_dtype=jnp.float32)
    mean, std = stochastic_net_gaussian_forward(state, belief, fused_f32)
    jax.block_until_ready((mean, std))
    assert mean.shape == (B, out_dim) and std.shape == (B, out_dim)
    assert jnp.allclose(mean, ref_mean, atol=1e-5, rtol=1e-5)
    assert jnp.allclose(std, ref_std, atol=1e-5, rtol=1e-5)
    assert bool(jnp.all(std > 0.0))

    # --- bf16 matmul operands, f32 epilogue (v6e/v7x fast path) -------------
    fused_bf16 = fuse_params(params, state_dim, matmul_dtype=jnp.bfloat16)
    mean_bf, std_bf = stochastic_net_gaussian_forward(state, belief, fused_bf16)
    jax.block_until_ready((mean_bf, std_bf))
    assert jnp.allclose(mean_bf, ref_mean, atol=2e-2, rtol=2e-2)
    assert jnp.allclose(std_bf, ref_std, atol=2e-2, rtol=2e-2)

    # --- exercise the batch grid (2 grid steps, weights stay resident) ------
    Bg = 128
    kg = jax.random.split(jax.random.PRNGKey(1), 2)
    state_g = jax.random.normal(kg[0], (Bg, state_dim), jnp.float32)
    belief_g = jax.random.normal(kg[1], (Bg, belief_dim), jnp.float32)
    mean_g, std_g = stochastic_net_gaussian_forward(
        state_g, belief_g, fused_f32, block_b=64)
    jax.block_until_ready((mean_g, std_g))
    ref_mean_g, ref_std_g = _reference_forward(state_g, belief_g, params)
    assert jnp.allclose(mean_g, ref_mean_g, atol=1e-5, rtol=1e-5)
    assert jnp.allclose(std_g, ref_std_g, atol=1e-5, rtol=1e-5)

    print("KERNEL_OK")
</pallas_src>

<mosaic_0001>
module attributes {stable_mosaic.version = 11 : i64} {
  func.func @_stochastic_net_kernel(%arg0: i32, %arg1: memref<8x16xf32, #tpu.memory_space<vmem>>, %arg2: memref<8x16xf32, #tpu.memory_space<vmem>>, %arg3: memref<16x32xf32, #tpu.memory_space<vmem>>, %arg4: memref<16x32xf32, #tpu.memory_space<vmem>>, %arg5: memref<1x32xf32, #tpu.memory_space<vmem>>, %arg6: memref<32x32xf32, #tpu.memory_space<vmem>>, %arg7: memref<1x32xf32, #tpu.memory_space<vmem>>, %arg8: memref<32x32xf32, #tpu.memory_space<vmem>>, %arg9: memref<1x32xf32, #tpu.memory_space<vmem>>, %arg10: memref<8x32xf32, #tpu.memory_space<vmem>>) attributes {dimension_semantics = [#tpu.dimension_semantics<parallel>], iteration_bounds = array<i64: 1>, scalar_prefetch = 0 : i64, scratch_operands = 0 : i64, tpu.core_type = #tpu.core_type<tc>, window_params = [{transform_indices = @transform_0, window_bounds = array<i64: 8, 16>}, {transform_indices = @transform_1, window_bounds = array<i64: 8, 16>}, {pipeline_mode = #tpu.pipeline_mode<synchronous>, transform_indices = @transform_2, window_bounds = array<i64: 16, 32>}, {pipeline_mode = #tpu.pipeline_mode<synchronous>, transform_indices = @transform_3, window_bounds = array<i64: 16, 32>}, {pipeline_mode = #tpu.pipeline_mode<synchronous>, transform_indices = @transform_4, window_bounds = array<i64: 1, 32>}, {pipeline_mode = #tpu.pipeline_mode<synchronous>, transform_indices = @transform_5, window_bounds = array<i64: 32, 32>}, {pipeline_mode = #tpu.pipeline_mode<synchronous>, transform_indices = @transform_6, window_bounds = array<i64: 1, 32>}, {pipeline_mode = #tpu.pipeline_mode<synchronous>, transform_indices = @transform_7, window_bounds = array<i64: 32, 32>}, {pipeline_mode = #tpu.pipeline_mode<synchronous>, transform_indices = @transform_8, window_bounds = array<i64: 1, 32>}, {transform_indices = @transform_9, window_bounds = array<i64: 8, 32>}]} {
    %c0 = arith.constant 0 : index
    %c0_0 = arith.constant 0 : index
    %0 = vector.load %arg1[%c0, %c0_0] : memref<8x16xf32, #tpu.memory_space<vmem>>, vector<8x16xf32>
    %c0_1 = arith.constant 0 : index
    %c0_2 = arith.constant 0 : index
    %1 = vector.load %arg2[%c0_1, %c0_2] : memref<8x16xf32, #tpu.memory_space<vmem>>, vector<8x16xf32>
    %c0_3 = arith.constant 0 : index
    %c0_4 = arith.constant 0 : index
    %2 = vector.load %arg3[%c0_3, %c0_4] : memref<16x32xf32, #tpu.memory_space<vmem>>, vector<16x32xf32>
    %cst = arith.constant dense<0.000000e+00> : vector<8x32xf32>
    %3 = tpu.matmul %0, %2, %cst {dimension_numbers = #tpu.dot_dimension_numbers<[1], [0], [0], [1], [0, 0, 1, 1], [], []>} : vector<8x16xf32>, vector<16x32xf32>, vector<8x32xf32> -> vector<8x32xf32>
    %c0_5 = arith.constant 0 : index
    %c0_6 = arith.constant 0 : index
    %4 = vector.load %arg4[%c0_5, %c0_6] : memref<16x32xf32, #tpu.memory_space<vmem>>, vector<16x32xf32>
    %cst_7 = arith.constant dense<0.000000e+00> : vector<8x32xf32>
    %5 = tpu.matmul %1, %4, %cst_7 {dimension_numbers = #tpu.dot_dimension_numbers<[1], [0], [0], [1], [0, 0, 1, 1], [], []>} : vector<8x16xf32>, vector<16x32xf32>, vector<8x32xf32> -> vector<8x32xf32>
    %6 = arith.addf %3, %5 : vector<8x32xf32>
    %c0_8 = arith.constant 0 : index
    %c0_9 = arith.constant 0 : index
    %7 = vector.load %arg5[%c0_8, %c0_9] : memref<1x32xf32, #tpu.memory_space<vmem>>, vector<1x32xf32>
    %8 = vector.broadcast %7 : vector<1x32xf32> to vector<8x32xf32>
    %9 = arith.addf %6, %8 : vector<8x32xf32>
    %cst_10 = arith.constant 0.000000e+00 : f32
    %10 = vector.broadcast %cst_10 : f32 to vector<8x32xf32>
    %11 = arith.maximumf %9, %10 : vector<8x32xf32>
    %c0_11 = arith.constant 0 : index
    %c0_12 = arith.constant 0 : index
    %12 = vector.load %arg6[%c0_11, %c0_12] : memref<32x32xf32, #tpu.memory_space<vmem>>, vector<32x32xf32>
    %cst_13 = arith.constant dense<0.000000e+00> : vector<8x32xf32>
    %13 = tpu.matmul %11, %12, %cst_13 {dimension_numbers = #tpu.dot_dimension_numbers<[1], [0], [0], [1], [0, 0, 1, 1], [], []>} : vector<8x32xf32>, vector<32x32xf32>, vector<8x32xf32> -> vector<8x32xf32>
    %c0_14 = arith.constant 0 : index
    %c0_15 = arith.constant 0 : index
    %14 = vector.load %arg7[%c0_14, %c0_15] : memref<1x32xf32, #tpu.memory_space<vmem>>, vector<1x32xf32>
    %15 = vector.broadcast %14 : vector<1x32xf32> to vector<8x32xf32>
    %16 = arith.addf %13, %15 : vector<8x32xf32>
    %cst_16 = arith.constant 0.000000e+00 : f32
    %17 = vector.broadcast %cst_16 : f32 to vector<8x32xf32>
    %18 = arith.maximumf %16, %17 : vector<8x32xf32>
    %c0_17 = arith.constant 0 : index
    %c0_18 = arith.constant 0 : index
    %19 = vector.load %arg8[%c0_17, %c0_18] : memref<32x32xf32, #tpu.memory_space<vmem>>, vector<32x32xf32>
    %cst_19 = arith.constant dense<0.000000e+00> : vector<8x32xf32>
    %20 = tpu.matmul %18, %19, %cst_19 {dimension_numbers = #tpu.dot_dimension_numbers<[1], [0], [0], [1], [0, 0, 1, 1], [], []>} : vector<8x32xf32>, vector<32x32xf32>, vector<8x32xf32> -> vector<8x32xf32>
    %c0_20 = arith.constant 0 : index
    %c0_21 = arith.constant 0 : index
    %21 = vector.load %arg9[%c0_20, %c0_21] : memref<1x32xf32, #tpu.memory_space<vmem>>, vector<1x32xf32>
    %22 = vector.broadcast %21 : vector<1x32xf32> to vector<8x32xf32>
    %23 = arith.addf %20, %22 : vector<8x32xf32>
    %24 = tpu.iota {dimensions = array<i32: 1>} : vector<1x32xi32>
    %c16_i32 = arith.constant 16 : i32
    %25 = vector.broadcast %c16_i32 : i32 to vector<1x32xi32>
    %26 = arith.cmpi sge, %24, %25 : vector<1x32xi32>
    %cst_22 = arith.constant -2.000000e+00 : f32
    %cst_23 = arith.constant 2.000000e+00 : f32
    %27 = vector.broadcast %cst_22 : f32 to vector<8x32xf32>
    %28 = arith.maximumf %27, %23 : vector<8x32xf32>
    %29 = vector.broadcast %cst_23 : f32 to vector<8x32xf32>
    %30 = arith.minimumf %29, %28 : vector<8x32xf32>
    %31 = math.exp %30 : vector<8x32xf32>
    %32 = vector.shape_cast %26 : vector<1x32xi1> to vector<1x32xi1>
    %33 = vector.broadcast %32 : vector<1x32xi1> to vector<8x32xi1>
    %34 = arith.select %33, %31, %23 : vector<8x32xi1>, vector<8x32xf32>
    %c0_24 = arith.constant 0 : index
    %c0_25 = arith.constant 0 : index
    %35 = vector.load %arg10[%c0_24, %c0_25] : memref<8x32xf32, #tpu.memory_space<vmem>>, vector<8x32xf32>
    tpu.vector_store %arg10[%c0_24, %c0_25], %34 {strides = array<i32>} : memref<8x32xf32, #tpu.memory_space<vmem>>, vector<8x32xf32>,
    return
  }
  func.func @transform_0(%arg0: i32) -> (i32, i32) {
    %c0_i32 = arith.constant 0 : i32
    %c0_i32_0 = arith.constant 0 : i32
    return %arg0, %c0_i32 : i32, i32
  }
  func.func @transform_1(%arg0: i32) -> (i32, i32) {
    %c0_i32 = arith.constant 0 : i32
    %c0_i32_0 = arith.constant 0 : i32
    return %arg0, %c0_i32 : i32, i32
  }
  func.func @transform_2(%arg0: i32) -> (i32, i32) {
    %c0_i32 = arith.constant 0 : i32
    %c0_i32_0 = arith.constant 0 : i32
    %c0_i32_1 = arith.constant 0 : i32
    return %c0_i32, %c0_i32_0 : i32, i32
  }
  func.func @transform_3(%arg0: i32) -> (i32, i32) {
    %c0_i32 = arith.constant 0 : i32
    %c0_i32_0 = arith.constant 0 : i32
    %c0_i32_1 = arith.constant 0 : i32
    return %c0_i32, %c0_i32_0 : i32, i32
  }
  func.func @transform_4(%arg0: i32) -> (i32, i32) {
    %c0_i32 = arith.constant 0 : i32
    %c0_i32_0 = arith.constant 0 : i32
    %c0_i32_1 = arith.constant 0 : i32
    return %c0_i32, %c0_i32_0 : i32, i32
  }
  func.func @transform_5(%arg0: i32) -> (i32, i32) {
    %c0_i32 = arith.constant 0 : i32
    %c0_i32_0 = arith.constant 0 : i32
    %c0_i32_1 = arith.constant 0 : i32
    return %c0_i32, %c0_i32_0 : i32, i32
  }
  func.func @transform_6(%arg0: i32) -> (i32, i32) {
    %c0_i32 = arith.constant 0 : i32
    %c0_i32_0 = arith.constant 0 : i32
    %c0_i32_1 = arith.constant 0 : i32
    return %c0_i32, %c0_i32_0 : i32, i32
  }
  func.func @transform_7(%arg0: i32) -> (i32, i32) {
    %c0_i32 = arith.constant 0 : i32
    %c0_i32_0 = arith.constant 0 : i32
    %c0_i32_1 = arith.constant 0 : i32
    return %c0_i32, %c0_i32_0 : i32, i32
  }
  func.func @transform_8(%arg0: i32) -> (i32, i32) {
    %c0_i32 = arith.constant 0 : i32
    %c0_i32_0 = arith.constant 0 : i32
    %c0_i32_1 = arith.constant 0 : i32
    return %c0_i32, %c0_i32_0 : i32, i32
  }
  func.func @transform_9(%arg0: i32) -> (i32, i32) {
    %c0_i32 = arith.constant 0 : i32
    %c0_i32_0 = arith.constant 0 : i32
    return %arg0, %c0_i32 : i32, i32
  }
}

</mosaic_0001>

<bundles_post_ra>
// kernel: tpu_custom_call.1
= control target key start
LH: loop header
LB: loop body
LE: loop exit
PB: predicated region body
PF: predicated region fallthrough
CT: control target
= control target key end

     0   :  { %14 = vsyncpa [#allocation3], 0  ;;  %s902_s0 = inlined_call_operand.hbm [shape: f32[8,16], index: 0, kind: input, shape index: {}]   ;;  %s903_s1 = inlined_call_operand.hbm [shape: f32[8,16], index: 1, kind: input, shape index: {}]   ;;  %s904_s2 = inlined_call_operand.hbm [shape: f32[16,32], index: 2, kind: input, shape index: {}]   ;;  %s905_s3 = inlined_call_operand.hbm [shape: f32[16,32], index: 3, kind: input, shape index: {}]   ;;  %s906_s4 = inlined_call_operand.vmem [shape: f32[1,32], index: 4, kind: input, shape index: {}]   ;;  %s907_s5 = inlined_call_operand.hbm [shape: f32[32,32], index: 5, kind: input, shape index: {}]   ;;  %s908_s6 = inlined_call_operand.vmem [shape: f32[1,32], index: 6, kind: input, shape index: {}]   ;;  %s909_s7 = inlined_call_operand.hbm [shape: f32[32,32], index: 7, kind: input, shape index: {}]   ;;  %s910_s8 = inlined_call_operand.vmem [shape: f32[1,32], index: 8, kind: input, shape index: {}]   ;;  %s911_s9 = inlined_call_operand.hbm [shape: f32[8,32], index: 9, kind: output, shape index: {}]  }
   0x1   :  { %15 = vsyncpa [#allocation6], 0 }
   0x2   :  { %16 = vsyncpa [#allocation9], 0 }
   0x3   :  { %17 = vsyncpa [#allocation12], 0 }
   0x4   :  { %18 = vsyncpa [#allocation4], 0  ;;  %s728_s30 = smov [#allocation5]   ;;  %s564_s13 = scalar_lea.hbm %s903_s1, 128 }
   0x5   :  { %s35_s10 = sshll.u32 %s728_s30, 4  ;;  %p565_p0 = scmp.ne.s32.totalorder %s903_s1, %s564_s13  ;;  %s36_s10 = int_to_ptr.vmem [resolvable:$true] %s35_s10 }
   0x6   :  { %p568_p1 = scmp.lt.u32.totalorder %s564_s13, %s903_s1 }
   0x8   :  { %p570_p2 = pnand %p568_p1, %p565_p0 }
   0xa   :  { %573 = shalt.err (!%p570_p2)
}
   0xb   :  { %s574_s18 = scalar_lea.vmem %s36_s10, 128  ;;  %p579_p4 = scmp.lt.s32.totalorder %s36_s10, %s36_s10 }
   0xc   :  { %p575_p3 = scmp.ne.s32.totalorder %s36_s10, %s574_s18  ;;  %p580_p5 = scmp.lt.s32.totalorder %s574_s18, %s574_s18 }
   0xe   :  { %p581_p6 = por %p580_p5, %p579_p4 }
  0x10   :  { %p582_p7 = pnand %p581_p6, %p575_p3 }
  0x12   :  { %585 = shalt.err (!%p582_p7)
}
  0x13   :  { %38 = dma.hbm_to_vmem [thread:$0]  %s903_s1, 128, %s36_s10, [#allocation6]  }
  0x14   :  { %s729_s21 = smov [#allocation8]   ;;  %s730_s23 = smov [#allocation2]  }
  0x15   :  { %s56_s22 = sshll.u32 %s729_s21, 4  ;;  %s25_s24 = sshll.u32 %s730_s23, 4  ;;  %s57_s22 = int_to_ptr.vmem [resolvable:$true] %s56_s22  ;;  %s26_s24 = int_to_ptr.vmem [resolvable:$true] %s25_s24 }
  0x16   :  { %s586_s27 = scalar_lea.hbm %s905_s3, 256 }
  0x17   :  { %p587_p8 = scmp.ne.s32.totalorder %s905_s3, %s586_s27  ;;  %p590_p9 = scmp.lt.u32.totalorder %s586_s27, %s905_s3 }
  0x19   :  { %p592_p10 = pnand %p590_p9, %p587_p8 }
  0x1b   :  { %595 = shalt.err (!%p592_p10)
}
  0x1c   :  { %s596_s1 = scalar_lea.vmem %s57_s22, 256  ;;  %p601_p12 = scmp.lt.s32.totalorder %s57_s22, %s57_s22 }
  0x1d   :  { %p597_p11 = scmp.ne.s32.totalorder %s57_s22, %s596_s1  ;;  %p602_p13 = scmp.lt.s32.totalorder %s596_s1, %s596_s1 }
  0x1f   :  { %p603_p0 = por %p602_p13, %p601_p12 }
  0x21   :  { %p604_p1 = pnand %p603_p0, %p597_p11 }
  0x23   :  { %607 = shalt.err (!%p604_p1)
}
  0x24   :  { %s731_s10 = smov 128   ;;  %s732_s12 = smov 8  }
  0x25   :  { %62 = dma.hbm_to_vmem [thread:$0]  %s905_s3, 256, %s57_s22, [#allocation9], %s731_s10, %s731_s10, %s732_s12  }
  0x26   :  { %s608_s17 = scalar_lea.hbm %s902_s0, 128 }
  0x27   :  { %p609_p2 = scmp.ne.s32.totalorder %s902_s0, %s608_s17  ;;  %p612_p3 = scmp.lt.u32.totalorder %s608_s17, %s902_s0 }
  0x29   :  { %p614_p4 = pnand %p612_p3, %p609_p2 }
  0x2b   :  { %617 = shalt.err (!%p614_p4)
}
  0x2c   :  { %s618_s23 = scalar_lea.vmem %s26_s24, 128  ;;  %p623_p6 = scmp.lt.s32.totalorder %s26_s24, %s26_s24 }
  0x2d   :  { %p619_p5 = scmp.ne.s32.totalorder %s26_s24, %s618_s23  ;;  %p624_p7 = scmp.lt.s32.totalorder %s618_s23, %s618_s23 }
  0x2f   :  { %p625_p8 = por %p624_p7, %p623_p6 }
  0x31   :  { %p626_p9 = pnand %p625_p8, %p619_p5 }
  0x33   :  { %629 = shalt.err (!%p626_p9)
}
  0x34   :  { %28 = dma.hbm_to_vmem [thread:$0]  %s902_s0, 128, %s26_s24, [#allocation3]  }
  0x35   :  { %s733_s25 = smov [#allocation7]   ;;  %s734_s27 = smov [#allocation10]  }
  0x36   :  { %s44_s26 = sshll.u32 %s733_s25, 4  ;;  %s70_s28 = sshll.u32 %s734_s27, 4  ;;  %s45_s26 = int_to_ptr.vmem [resolvable:$true] %s44_s26  ;;  %s71_s28 = int_to_ptr.vmem [resolvable:$true] %s70_s28 }
  0x37   :  { %s630_s11 = scalar_lea.hbm %s904_s2, 256 }
  0x38   :  { %p631_p10 = scmp.ne.s32.totalorder %s904_s2, %s630_s11  ;;  %p634_p11 = scmp.lt.u32.totalorder %s630_s11, %s904_s2 }
  0x3a   :  { %p636_p12 = pnand %p634_p11, %p631_p10 }
  0x3c   :  { %639 = shalt.err (!%p636_p12)
}
  0x3d   :  { %s640_s0 = scalar_lea.vmem %s45_s26, 256  ;;  %p645_p0 = scmp.lt.s32.totalorder %s45_s26, %s45_s26 }
  0x3e   :  { %p641_p13 = scmp.ne.s32.totalorder %s45_s26, %s640_s0  ;;  %p646_p1 = scmp.lt.s32.totalorder %s640_s0, %s640_s0 }
  0x40   :  { %p647_p2 = por %p646_p1, %p645_p0 }
  0x42   :  { %p648_p3 = pnand %p647_p2, %p641_p13 }
  0x44   :  { %651 = shalt.err (!%p648_p3)
}
  0x45   :  { %50 = dma.hbm_to_vmem [thread:$0]  %s904_s2, 256, %s45_s26, [#allocation6], %s731_s10, %s731_s10, %s732_s12  }
  0x46   :  { %s652_s19 = scalar_lea.hbm %s907_s5, 512 }
  0x47   :  { %p653_p4 = scmp.ne.s32.totalorder %s907_s5, %s652_s19  ;;  %p656_p5 = scmp.lt.u32.totalorder %s652_s19, %s907_s5 }
  0x49   :  { %p658_p6 = pnand %p656_p5, %p653_p4 }
  0x4b   :  { %661 = shalt.err (!%p658_p6)
}
  0x4c   :  { %s662_s22 = scalar_lea.vmem %s71_s28, 512  ;;  %p667_p8 = scmp.lt.s32.totalorder %s71_s28, %s71_s28 }
  0x4d   :  { %p663_p7 = scmp.ne.s32.totalorder %s71_s28, %s662_s22  ;;  %p668_p9 = scmp.lt.s32.totalorder %s662_s22, %s662_s22 }
  0x4f   :  { %p669_p10 = por %p668_p9, %p667_p8 }
  0x51   :  { %p670_p11 = pnand %p669_p10, %p663_p7 }
  0x53   :  { %673 = shalt.err (!%p670_p11)
}
  0x54   :  { %76 = dma.hbm_to_vmem [thread:$0]  %s907_s5, 512, %s71_s28, [#allocation9], %s731_s10, %s731_s10, %s732_s12  }
  0x55   :  { %s735_s26 = smov [#allocation11]   ;;  %s674_s11 = scalar_lea.hbm %s909_s7, 512 }
  0x56   :  { %s84_s27 = sshll.u32 %s735_s26, 4  ;;  %p675_p12 = scmp.ne.s32.totalorder %s909_s7, %s674_s11  ;;  %s85_s27 = int_to_ptr.vmem [resolvable:$true] %s84_s27 }
  0x57   :  { %p678_p13 = scmp.lt.u32.totalorder %s674_s11, %s909_s7 }
  0x59   :  { %p680_p0 = pnand %p678_p13, %p675_p12 }
  0x5b   :  { %683 = shalt.err (!%p680_p0)
}
  0x5c   :  { %s684_s0 = scalar_lea.vmem %s85_s27, 512  ;;  %p689_p2 = scmp.lt.s32.totalorder %s85_s27, %s85_s27 }
  0x5d   :  { %p685_p1 = scmp.ne.s32.totalorder %s85_s27, %s684_s0  ;;  %p690_p3 = scmp.lt.s32.totalorder %s684_s0, %s684_s0 }
  0x5f   :  { %p691_p4 = por %p690_p3, %p689_p2 }
  0x61   :  { %p692_p5 = pnand %p691_p4, %p685_p1 }
  0x63   :  { %695 = shalt.err (!%p692_p5)
}
  0x64   :  { %90 = dma.hbm_to_vmem [thread:$0]  %s909_s7, 512, %s85_s27, [#allocation12], %s731_s10, %s731_s10, %s732_s12  }
  0x65   :  { %718 = dma.done.wait [#allocation3], 128  }
  0x66   :  { %719 = vsyncadd [#allocation3], 4294967168 }
  0x67   :  { %720 = dma.done.wait [#allocation6], 384  }
  0x68   :  { %721 = vsyncadd [#allocation6], 4294966912 }
  0x69   :  { %722 = dma.done.wait [#allocation9], 768  }
  0x6a   :  { %723 = vsyncadd [#allocation9], 4294966528 }
  0x6b   :  { %724 = dma.done.wait [#allocation12], 512  }
  0x6c   :  { %725 = vsyncadd [#allocation12], 4294966784  ;;  %v736_v0 = vmov 0.0|0.0   ;;  %vm737_vm0 = vmmov 0   ;;  %v738_v1 = vmov 0.0   ;;  %v115_v2 = vld [vmem:[#allocation8] sm:$0xff]  ;;  %v443_v41 = vlaneseq }
  0x6d   :  { %532 = vmatprep.subr.bf16.mxu0 %v736_v0  ;;  %535 = vmatprep.subr.bf16.mxu1 %v736_v0  ;;  %v116_v3 = vld [vmem:[#allocation8 + $0x8] sm:$0xff]  ;;  %v113_v4 = vld [vmem:[#allocation7] sm:$0xff]  ;;  %v114_v6 = vld [vmem:[#allocation7 + $0x8] sm:$0xff]  ;;  %vm117_vm1 = vcmask 130048   ;;  %vm284_vm2 = vcmask 261120   ;;  %s739_s17 = smov [#allocation13]  }
  0x6e   :  { %500 = vmatprep.mubr.msk.f32.mxu0 %vm737_vm0, %v738_v1  ;;  %507 = vmatprep.mubr.msk.f32.mxu1 %vm737_vm0, %v738_v1  ;;  %v533_v5 = vpack.c.bf16 %v116_v3, %v115_v2  ;;  %v536_v7 = vpack.c.bf16 %v114_v6, %v113_v4  ;;  %v112_v8 = vld [vmem:[#allocation5] sm:$0xff]  ;;  %v111_v9 = vld [vmem:[#allocation2] sm:$0xff]  ;;  %v273_v10 = vld [vmem:[#allocation10] sm:$0xff]  ;;  %v444_v42 = vand.u32 127, %v443_v41 }
  0x6f   :  { %v274_v11 = vld [vmem:[#allocation10 + $0x8] sm:$0xff]  ;;  %v275_v13 = vld [vmem:[#allocation10 + $0x10] sm:$0xff]  ;;  %v276_v14 = vld [vmem:[#allocation10 + $0x18] sm:$0xff] }
  0x70   :  { %534 = vmatpush3.bf16.msra.mxu0 %v533_v5  ;;  %537 = vmatpush3.bf16.msra.mxu1 %v536_v7  ;;  %v539_v12 = vpack.c.bf16 %v274_v11, %v273_v10  ;;  %v542_v15 = vpack.c.bf16 %v276_v14, %v275_v13  ;;  %v359_v16 = vld [vmem:[#allocation11] sm:$0xff]  ;;  %v360_v17 = vld [vmem:[#allocation11 + $0x8] sm:$0xff]  ;;  %v474_v21 = vld [vmem:[%s906_s4] ss:$0 sm:$0xff]  ;;  %vm445_vm3 = vcmp.ge.s32.totalorder %v444_v42, 16 }
  0x71   :  { %538 = vmatprep.subr.bf16.mxu0 %v736_v0  ;;  %544 = vmatprep.subr.bf16.mxu1 %v736_v0  ;;  %v545_v18 = vpack.c.bf16 %v360_v17, %v359_v16  ;;  %v361_v27 = vld [vmem:[#allocation11 + $0x10] sm:$0xff]  ;;  %v362_v28 = vld [vmem:[#allocation11 + $0x18] sm:$0xff] }
  0x72   :  { %v548_v29 = vpack.c.bf16 %v362_v28, %v361_v27  ;;  %v475_v30 = vld [vmem:[%s908_s6] ss:$0 sm:$0xff]  ;;  %s460_s6 = sshll.u32 %s739_s17, 4  ;;  %s461_s6 = int_to_ptr.vmem [resolvable:$true] %s460_s6 }
  0x73   :  { %501 = vmatmul.mubr.msk.f32.vlgmr.msra.gmra.mrb[0].mxu0 %vm117_vm1, %v112_v8  ;;  %508 = vmatmul.mubr.msk.f32.vlgmr.msra.gmra.mrb[0].mxu1 %vm117_vm1, %v111_v9  ;;  %v477_v35 = vld [vmem:[%s910_s8] ss:$0 sm:$0xff]  ;;  %s696_s18 = scalar_lea.vmem %s461_s6, 128  ;;  %p701_p7 = scmp.lt.s32.totalorder %s461_s6, %s461_s6 }
  0x74   :  { %518 = vmatprep.mubr.msk.f32.mxu0 %vm737_vm0, %v738_v1  ;;  %529 = vmatprep.mubr.msk.f32.mxu1 %vm737_vm0, %v738_v1  ;;  %p697_p6 = scmp.ne.s32.totalorder %s461_s6, %s696_s18  ;;  %p702_p8 = scmp.lt.s32.totalorder %s696_s18, %s696_s18 }
  0x75   :  { %540 = vmatpush3.bf16.msra.mxu0 %v539_v12  ;;  %546 = vmatpush3.bf16.msra.mxu1 %v545_v18 }
  0x76   :  { %541 = vmatprep.subr.bf16.mxu0 %v736_v0  ;;  %547 = vmatprep.subr.bf16.mxu1 %v736_v0  ;;  %p703_p9 = por %p702_p8, %p701_p7 }
  0x78   :  { %p704_p10 = pnand %p703_p9, %p697_p6 }
  0x79   :  { %543 = vmatpush3.bf16.msra.mxu0 %v542_v15  ;;  %549 = vmatpush3.bf16.msra.mxu1 %v548_v29 }
 0x146   :  { %v187_v19 = vpop.f32.mrb[0].mxu0  ;;  %v260_v20 = vpop.f32.mrb[0].mxu1 }
 0x147   :  { %v502_v22 = vpop.f32.mrb[1].mxu0  ;;  %v261_v23 = vadd.f32 %v260_v20, %v187_v19  ;;  %v509_v24 = vpop.f32.mrb[1].mxu1 }
 0x149   :  { %v271_v25 = vadd.f32 %v474_v21, %v261_v23 }
 0x14b   :  { %v272_v26 = vmax.f32 %v271_v25, 0.0 }
 0x14d   :  { %519 = vmatmul.mubr.msk.f32.vlgmr.msra.gmra.mrb[2].mxu0 %vm284_vm2, %v272_v26 }
 0x220   :  { %v354_v31 = vpop.f32.mrb[2].mxu0 }
 0x221   :  { %v355_v32 = vadd.f32 %v475_v30, %v354_v31  ;;  %v520_v33 = vpop.f32.mrb[3].mxu0 }
 0x223   :  { %v358_v34 = vmax.f32 %v355_v32, 0.0 }
 0x225   :  { %530 = vmatmul.mubr.msk.f32.vlgmr.msra.gmra.mrb[2].mxu1 %vm284_vm2, %v358_v34 }
 0x2f8   :  { %v439_v36 = vpop.f32.mrb[2].mxu1 }
 0x2f9   :  { %v440_v37 = vadd.f32 %v477_v35, %v439_v36  ;;  %v531_v38 = vpop.f32.mrb[3].mxu1 }
 0x2fb   :  { %v479_v39 = vclamps-f32 %v440_v37, 2.0 }
 0x2fd   :  { %v448_v40 = vmul.f32 1.442695, %v479_v39 }
 0x2ff   :  { %562 = vpow2.f32 %v448_v40 }
 0x309   :  { %v563_v43 = vpop.eup %562 }
 0x30a   :  { %v452_v44 = vsel %vm445_vm3, %v563_v43, %v440_v37 }
 0x30b   :  { %453 = vst.msk [vmem:[#allocation13] sm:$0xff] %vm284_vm2, %v452_v44 }
 0x30c   :  { %707 = shalt.err (!%p704_p10)
}
 0x30d   :  { %s708_s20 = scalar_lea.hbm %s911_s9, 128 }
 0x30e   :  { %p709_p11 = scmp.ne.s32.totalorder %s911_s9, %s708_s20  ;;  %p712_p12 = scmp.lt.u32.totalorder %s708_s20, %s911_s9 }
 0x310   :  { %p714_p13 = pnand %p712_p12, %p709_p11 }
 0x312   :  { %717 = shalt.err (!%p714_p13)
}
 0x313   :  { %463 = dma.vmem_to_hbm [thread:$0]  %s461_s6, 128, %s911_s9, [#allocation4]  }
 0x314   :  { %726 = dma.done.wait [#allocation4], 128  }
 0x315   :  { %727 = vsyncadd [#allocation4], 4294967168 }
 0x316   :  { %467 = vsyncpa [#allocation3], 1 }
 0x317   :  { %468 = vsyncpa [#allocation6], 1 }
 0x318   :  { %469 = vsyncpa [#allocation9], 1 }
 0x319   :  { %470 = vsyncpa [#allocation12], 1 }
 0x31a   :  { %471 = vsyncpa [#allocation4], 1 }

</bundles_post_ra>
